<compile_context>
chip_gen: v5e
topology: v5e:2x2
jax: 0.10.0
libtpu: 0.0.40
codegen_flags: <defaults>
</compile_context>

<pallas_src>
import functools

import jax
import jax.numpy as jnp
from jax.experimental import pallas as pl
from jax.experimental.pallas import tpu as pltpu


def _l2n_kernel(x_ref, o_ref, *, eps):
    # x_ref / o_ref: (C, T_HW) tile (batch dim squeezed away).
    x = x_ref[...]
    xf = x.astype(jnp.float32)
    # Sum of squares over the channel (sublane) axis -> (1, T_HW).
    sq_sum = jnp.sum(xf * xf, axis=0, keepdims=True)
    # sqrt + reciprocal on the small row go to the EUP slot (effectively
    # free); only one broadcast multiply per element remains on the VPU.
    inv = pl.reciprocal(jnp.sqrt(sq_sum) + eps, approx=False)
    o_ref[...] = (x * inv).astype(o_ref.dtype)


def _pick_hw_tile(hw, c, itemsize, target_bytes=1 << 20):
    """Lane tile: multiple of 128, sized for ~target_bytes per input block."""
    t = (target_bytes // max(1, c * itemsize)) // 128 * 128
    t = max(128, min(t, pl.cdiv(hw, 128) * 128))
    return int(t)


def l2n_pallas(x, eps=1e-6):
    """x: (N, C, H, W) array. Returns x / (||x||_2 over C, keepdim) + eps)."""
    N, C, H, W = x.shape
    HW = H * W
    x2 = x.reshape(N, C, HW)

    t_hw = _pick_hw_tile(HW, C, x.dtype.itemsize)
    n_hw = pl.cdiv(HW, t_hw)
    hw_pad = n_hw * t_hw
    if hw_pad != HW:
        # Zero-pad the lane axis so every tile is full and stores stay
        # unmasked (lane-dense).  The channel reduction never mixes lanes,
        # so padded columns are simply 0/(0+eps)=0 and get sliced off below.
        x2 = jnp.pad(x2, ((0, 0), (0, 0), (0, hw_pad - HW)))

    kernel = functools.partial(_l2n_kernel, eps=eps)

    out = pl.pallas_call(
        kernel,
        out_shape=jax.ShapeDtypeStruct((N, C, hw_pad), x.dtype),
        grid_spec=pltpu.PrefetchScalarGridSpec(
            num_scalar_prefetch=0,
            grid=(N, n_hw),
            in_specs=[
                pl.BlockSpec((pl.Squeezed(), C, t_hw), lambda n, h: (n, 0, h))
            ],
            out_specs=pl.BlockSpec(
                (pl.Squeezed(), C, t_hw), lambda n, h: (n, 0, h)
            ),
        ),
        compiler_params=pltpu.CompilerParams(
            dimension_semantics=("parallel", "parallel"),
        ),
    )(x2)

    if hw_pad != HW:
        out = out[:, :, :HW]
    return out.reshape(N, C, H, W)


def l2n_ref(x, eps=1e-6):
    norm = jnp.sqrt(jnp.sum(x.astype(jnp.float32) ** 2, axis=1, keepdims=True))
    return (x.astype(jnp.float32) / (norm + eps)).astype(x.dtype)


if __name__ == "__main__":
    key = jax.random.PRNGKey(0)
    x = jax.random.normal(key, (2, 4, 16, 16), dtype=jnp.float32)

    y = l2n_pallas(x, eps=1e-6)
    jax.block_until_ready(y)

    y_ref = l2n_ref(x, eps=1e-6)
    assert y.shape == x.shape and y.dtype == x.dtype
    assert jnp.allclose(y, y_ref, atol=1e-5, rtol=1e-5), "mismatch vs reference"

    print("KERNEL_OK")
</pallas_src>

<mosaic_0001>
module attributes {stable_mosaic.version = 11 : i64} {
  func.func @_l2n_kernel(%arg0: i32, %arg1: i32, %arg2: memref<1x4x256xf32, #tpu.memory_space<vmem>>, %arg3: memref<1x4x256xf32, #tpu.memory_space<vmem>>) attributes {dimension_semantics = [#tpu.dimension_semantics<parallel>, #tpu.dimension_semantics<parallel>], iteration_bounds = array<i64: 2, 1>, scalar_prefetch = 0 : i64, scratch_operands = 0 : i64, tpu.core_type = #tpu.core_type<tc>, window_params = [{transform_indices = @transform_0, window_bounds = array<i64: 1, 4, 256>}, {transform_indices = @transform_1, window_bounds = array<i64: 1, 4, 256>}]} {
    %c0 = arith.constant 0 : index
    %c0_0 = arith.constant 0 : index
    %c0_1 = arith.constant 0 : index
    %0 = vector.load %arg2[%c0, %c0_0, %c0_1] : memref<1x4x256xf32, #tpu.memory_space<vmem>>, vector<1x4x256xf32>
    %1 = vector.shape_cast %0 : vector<1x4x256xf32> to vector<4x256xf32>
    %2 = arith.mulf %1, %1 : vector<4x256xf32>
    %cst = arith.constant dense<0.000000e+00> : vector<256xf32>
    %3 = vector.multi_reduction <add>, %2, %cst [0] : vector<4x256xf32> to vector<256xf32>
    %4 = vector.shape_cast %3 : vector<256xf32> to vector<1x256xf32>
    %5 = math.sqrt %4 : vector<1x256xf32>
    %cst_2 = arith.constant 9.99999997E-7 : f32
    %6 = vector.broadcast %cst_2 : f32 to vector<1x256xf32>
    %7 = arith.addf %5, %6 : vector<1x256xf32>
    %8 = tpu.reciprocal %7 : vector<1x256xf32> -> vector<1x256xf32>
    %9 = vector.broadcast %8 : vector<1x256xf32> to vector<4x256xf32>
    %10 = arith.mulf %1, %9 : vector<4x256xf32>
    %c0_3 = arith.constant 0 : index
    %c0_4 = arith.constant 0 : index
    %c0_5 = arith.constant 0 : index
    %11 = vector.load %arg3[%c0_3, %c0_4, %c0_5] : memref<1x4x256xf32, #tpu.memory_space<vmem>>, vector<1x4x256xf32>
    %12 = vector.shape_cast %11 : vector<1x4x256xf32> to vector<4x256xf32>
    %13 = vector.shape_cast %10 : vector<4x256xf32> to vector<1x4x256xf32>
    tpu.vector_store %arg3[%c0_3, %c0_4, %c0_5], %13 {strides = array<i32>} : memref<1x4x256xf32, #tpu.memory_space<vmem>>, vector<1x4x256xf32>,
    return
  }
  func.func @transform_0(%arg0: i32, %arg1: i32) -> (i32, i32, i32) {
    %c0_i32 = arith.constant 0 : i32
    %c0_i32_0 = arith.constant 0 : i32
    return %arg0, %c0_i32, %arg1 : i32, i32, i32
  }
  func.func @transform_1(%arg0: i32, %arg1: i32) -> (i32, i32, i32) {
    %c0_i32 = arith.constant 0 : i32
    %c0_i32_0 = arith.constant 0 : i32
    return %arg0, %c0_i32, %arg1 : i32, i32, i32
  }
}

</mosaic_0001>

<bundles_post_ra>
// kernel: tpu_custom_call.1
= control target key start
LH: loop header
LB: loop body
LE: loop exit
PB: predicated region body
PF: predicated region fallthrough
CT: control target
= control target key end

     0   :  { %6 = vsyncpa [#allocation3], 0  ;;  %s691_s0 = inlined_call_operand.hbm [shape: f32[2,4,256], index: 0, kind: input, shape index: {}]   ;;  %s692_s1 = inlined_call_operand.hbm [shape: f32[2,4,256], index: 1, kind: output, shape index: {}]  }
   0x1   :  { %8 = vsyncpa [#allocation3 + $0x1], 0 }
   0x2   :  { %9 = vsyncpa [#allocation4], 0 }
   0x3   :  { %11 = vsyncpa [#allocation4 + $0x1], 0  ;;  %s553_s6 = smov 0   ;;  %s555_s7 = smov 0  }
   0x4   :  { %s557_s8 = smov 0   ;;  %s559_s9 = smov 0  }
   0x5   :  { %s561_s10 = smov 0   ;;  %s563_s11 = smov 0  }
   0x6 LB: > { %s342_s12 = sadd.s32 4294967295, %s541_s11   ;;  %s343_s13 = sadd.s32 4294967294, %s541_s11   ;;  %s541_s11 = sphi %s563_s11, %s17_s11   ;;  %s537_s10 = sphi %s561_s10, %s703_s10   ;;  %s533_s9 = sphi %s559_s9, %s702_s9   ;;  %s529_s8 = sphi %s557_s8, %s701_s8   ;;  %s525_s7 = sphi %s555_s7, %s700_s7   ;;  %s521_s6 = sphi %s553_s6, %s699_s6  }
   0x7   : > { %s29_s14 = sadd.s32 1, %s537_s10  ;;  %s38_s15 = sadd.s32 1, %s529_s8 }
   0x8   : > { %p31_p0 = scmp.ge.s32.totalorder %s29_s14, 2  ;;  %p45_p1 = scmp.ne.s32.totalorder %s529_s8, %s525_s7 }
   0x9   : > { %p46_p2 = scmp.eq.s32.totalorder %s541_s11, 0  ;;  %p51_p3 = scmp.ne.s32.totalorder %s525_s7, %s521_s6 }
   0xa   : > { %s705_s14 = smov (%p31_p0, %s29_s14), 0  ;;  %p52_p5 = scmp.eq.s32.totalorder %s342_s12, 0 }
   0xb   : > { %p594_p4 = por %p46_p2, %p45_p1  ;;  %s33_s17 = ssub.s32 %s537_s10, %s705_s14 }
   0xc   : > { %p77_p6 = scmp.eq.s32.totalorder %s342_s12, 1  ;;  %p36_p7 = scmp.eq.s32.totalorder %s33_s17, 0 }
   0xd   : > { %p600_p8 = por %p52_p5, %p51_p3  ;;  %p83_p10 = scmp.eq.s32.totalorder %s343_s13, 1 }
   0xe   : > { %p604_p9 = por %p77_p6, %p45_p1  ;;  %p345_p12 = scmp.ge.s32.totalorder %s541_s11, 2 }
   0xf   : > { %s609_s20 = scalar_select %p36_p7, %s529_s8, %s38_s15  }
  0x10   : > { %p611_p11 = por %p83_p10, %p51_p3  ;;  %p371_p13 = scmp.lt.s32.totalorder %s541_s11, 2 }
  0x11   : > { %s103_s22 = sand.u32 1, %s529_s8   ;;  %s357_s24 = sshll.u32 %s537_s10, 3 }
  0x12   : > { %s346_s23 = sshll.u32 %s103_s22, 3  ;;  %s114_s27 = scalar_lea.hbm %s691_s0, %s357_s24 }
  0x13   : > { %s107_s28 = scalar_lea.vmem [#allocation2], %s346_s23  ;;  %s116_s30 = sshll.u32 %s114_s27, 4  ;;  %s117_s30 = int_to_ptr.hbm [resolvable:$true] %s116_s30 }
  0x14   : > { %s118_s29 = sshll.u32 %s107_s28, 4  ;;  %p364_p0 = pnand %p371_p13, %p594_p4  ;;  %s119_s29 = int_to_ptr.vmem [resolvable:$true] %s118_s29 }
  0x15   : > { %p349_p1 = scmp.ge.s32.totalorder %s541_s11, 1  ;;  %p123_p2 = scmp.lt.s32.totalorder %s541_s11, 3 }
  0x16   : > { %s104_s2 = scalar_lea.sflag [#allocation3], %s103_s22 }
  0x17   : > { %366 = dma.hbm_to_vmem [thread:$0]  (!%p364_p0), %s117_s30, 128, %s119_s29, %s104_s2  }
  0x18   : > { %p124_p3 = pnand %p349_p1, %p123_p2 }
  0x19   : > { %s627_s3 = sand.u32 (!%p124_p3), 1, %s525_s7  }
  0x1a   : > { %127 = sbr.rel (%p124_p3) target bundleno = 105 (0x69), region = 24  ;;  %s350_s4 = sshll.u32 (!%p124_p3), %s627_s3, 3 }
  0x1b   : > { %s130_s5 = scalar_lea.sflag (!%p124_p3), [#allocation3], %s627_s3  ;;  %s133_s12 = scalar_lea.vmem (!%p124_p3), [#allocation2], %s350_s4 }
  0x1f   : > { %512 = dma.done.wait (%p600_p8), %s130_s5, 128  }
  0x20   : > { %514 = vsyncadd (%p600_p8), %s130_s5, 4294967168  ;;  %v637_v0 = vld [vmem:[%s133_s12] sm:$0xff]  ;;  %vm163_vm0 = vcmask 1043456   ;;  %s358_s13 = sshll.u32 %s533_s9, 3  ;;  %s152_s9 = scalar_lea.vmem [#allocation5], %s350_s4 }
  0x21   : > { %v156_v1 = vmul.f32 %v637_v0, %v637_v0  ;;  %s253_s17 = scalar_lea.hbm %s692_s1, %s358_s13  ;;  %s255_s18 = sshll.u32 %s152_s9, 4  ;;  %s256_s18 = int_to_ptr.vmem [resolvable:$true] %s255_s18 }
  0x22   : > { %s257_s22 = sshll.u32 %s253_s17, 4  ;;  %s240_s23 = scalar_lea.sflag [#allocation4], %s627_s3  ;;  %s258_s22 = int_to_ptr.hbm [resolvable:$true] %s257_s22 }
  0x23   : > { %158 = vst [vmem:[#allocation1] ss:$2 sm:$0xff] %v156_v1  ;;  %s473_s24 = sshra.s32 %s258_s22, 4  ;;  %s479_s28 = scalar_lea.hbm %s692_s1, 16  ;;  %s474_s24 = int_to_ptr.hbm [resolvable:$true] %s473_s24 }
  0x24   : > { %s475_s25 = scalar_lea.hbm %s474_s24, 8  ;;  %p480_p7 = scmp.lt.s32.totalorder %s474_s24, %s692_s1 }
  0x25   : > { %p476_p4 = scmp.ne.s32.totalorder %s474_s24, %s475_s25  ;;  %p481_p8 = scmp.lt.s32.totalorder %s479_s28, %s475_s25 }
  0x27   : > { %p477_p5 = pnand %p476_p4, %p604_p9  ;;  %p482_p10 = por %p481_p8, %p480_p7 }
  0x29   : > { %p478_p6 = pneg %p477_p5 }
  0x2a   : > { %v159_v2 = vld.sshfl [vmem:[#allocation1] sm:$0xff pattern:$0x75316420]  ;;  %v160_v3 = vld.sshfl [vmem:[#allocation1 + $0x8] sm:$0xff pattern:$0x75316420] }
  0x2b   : > { %v164_v4 = vsel %vm163_vm0, %v159_v2, 0.0  ;;  %v171_v5 = vsel %vm163_vm0, %v160_v3, 0.0  ;;  %p483_p13 = pnand %p482_p10, %p478_p6 }
  0x2c   : > { %v165_v6 = vrot.slane %v164_v4, 4  ;;  %v172_v7 = vrot.slane %v171_v5, 4 }
  0x2e   : > { %v166_v8 = vadd.f32 %v165_v6, %v164_v4  ;;  %v173_v9 = vadd.f32 %v172_v7, %v171_v5 }
  0x30   : > { %v167_v10 = vrot.slane %v166_v8, 2  ;;  %v174_v11 = vrot.slane %v173_v9, 2 }
  0x32   : > { %v168_v12 = vadd.f32 %v167_v10, %v166_v8  ;;  %v175_v13 = vadd.f32 %v174_v11, %v173_v9 }
  0x34   : > { %v169_v14 = vrot.slane %v168_v12, 1  ;;  %v176_v15 = vrot.slane %v175_v13, 1 }
  0x36   : > { %v170_v16 = vadd.f32 %v169_v14, %v168_v12  ;;  %v177_v17 = vadd.f32 %v176_v15, %v175_v13 }
  0x38   : > { %421 = vrsqrt.f32 %v170_v16  ;;  %vm185_vm1 = vcmp.eq.f32.partialorder %v170_v16, inf  ;;  %v188_v31 = vand.u32 2147483648, %v170_v16  ;;  %vm187_vm2 = vcmp.eq.f32.partialorder %v170_v16, 0.0 }
  0x39   : > { %423 = vrsqrt.f32 %v177_v17  ;;  %vm197_vm3 = vcmp.eq.f32.partialorder %v177_v17, inf  ;;  %v200_v34 = vand.u32 2147483648, %v177_v17  ;;  %vm199_vm4 = vcmp.eq.f32.partialorder %v177_v17, 0.0 }
  0x3e   : > { %v422_v18 = vpop.eup %421 }
  0x3f   : > { %v424_v19 = vpop.eup %423  ;;  %v179_v20 = vmul.f32 %v422_v18, %v170_v16 }
  0x40   : > { %v191_v21 = vmul.f32 %v424_v19, %v177_v17 }
  0x41   : > { %v180_v22 = vmul.f32 %v422_v18, %v179_v20 }
  0x42   : > { %v192_v23 = vmul.f32 %v424_v19, %v191_v21 }
  0x43   : > { %v181_v24 = vmul.f32 0.5, %v180_v22 }
  0x44   : > { %v193_v25 = vmul.f32 0.5, %v192_v23 }
  0x45   : > { %v182_v26 = vsub.f32 1.5, %v181_v24 }
  0x46   : > { %v194_v27 = vsub.f32 1.5, %v193_v25 }
  0x47   : > { %v183_v28 = vmul.f32 %v422_v18, %v182_v26 }
  0x48   : > { %v195_v29 = vmul.f32 %v424_v19, %v194_v27 }
  0x49   : > { %v184_v30 = vmul.f32 %v183_v28, %v170_v16 }
  0x4a   : > { %v196_v32 = vmul.f32 %v195_v29, %v177_v17 }
  0x4b   : > { %v186_v33 = vsel %vm185_vm1, %v170_v16, %v184_v30 }
  0x4c   : > { %v189_v35 = vsel %vm187_vm2, %v188_v31, %v186_v33  ;;  %v198_v36 = vsel %vm197_vm3, %v177_v17, %v196_v32 }
  0x4d   : > { %v201_v37 = vsel %vm199_vm4, %v200_v34, %v198_v36  ;;  %v202_v38 = vadd.f32 1e-06, %v189_v35 }
  0x4e   : > { %v203_v39 = vadd.f32 1e-06, %v201_v37 }
  0x4f   : > { %425 = vrcp.f32 %v202_v38  ;;  %vm209_vm7 = vweird.f32 %v202_v38  ;;  %v215_v51 = vand.u32 2147483648, %v202_v38  ;;  %v213_v53 = vand.u32 2147483647, %v202_v38 }
  0x50   : > { %427 = vrcp.f32 %v203_v39  ;;  %v229_v47 = vand.u32 2147483648, %v203_v39  ;;  %v227_v49 = vand.u32 2147483647, %v203_v39  ;;  %vm223_vm9 = vweird.f32 %v203_v39 }
  0x51   : > { %v216_v58 = vor.u32 1.1754944e-38, %v215_v51  ;;  %vm214_vm12 = vcmp.eq.f32.partialorder %v213_v53, 8.507059e+37 }
  0x52   : > { %v230_v55 = vor.u32 1.1754944e-38, %v229_v47  ;;  %vm228_vm11 = vcmp.eq.f32.partialorder %v227_v49, 8.507059e+37 }
  0x55   : > { %v426_v40 = vpop.eup %425 }
  0x56   : > { %v428_v41 = vpop.eup %427  ;;  %v205_v42 = vmul.f32 %v426_v40, %v202_v38  ;;  %vm210_vm5 = vweird.f32 %v426_v40 }
  0x57   : > { %v219_v43 = vmul.f32 %v428_v41, %v203_v39  ;;  %vm224_vm6 = vweird.f32 %v428_v41  ;;  %vm644_vm8 = vmor %vm209_vm7, %vm210_vm5 }
  0x58   : > { %v206_v44 = vsub.f32 1.0, %v205_v42  ;;  %vm225_vm10 = vmor %vm223_vm9, %vm224_vm6 }
  0x59   : > { %v220_v45 = vsub.f32 1.0, %v219_v43 }
  0x5a   : > { %v207_v46 = vmul.f32 %v426_v40, %v206_v44 }
  0x5b   : > { %v221_v48 = vmul.f32 %v428_v41, %v220_v45 }
  0x5c   : > { %v208_v50 = vadd.f32 %v426_v40, %v207_v46 }
  0x5d   : > { %v222_v54 = vadd.f32 %v428_v41, %v221_v48 }
  0x5e   : > { %v212_v56 = vsel %vm644_vm8, %v426_v40, %v208_v50 }
  0x5f   : > { %v226_v57 = vsel %vm225_vm10, %v428_v41, %v222_v54  ;;  %v217_v61 = vsel %vm214_vm12, %v216_v58, %v212_v56 }
  0x60   : > { %v231_v59 = vsel %vm228_vm11, %v230_v55, %v226_v57 }
  0x61   : > { %v234_v60 = vrot.slane %v231_v59, 4 }
  0x63   : > { %v235_v62 = vsel %vm163_vm0, %v217_v61, %v234_v60 }
  0x64   : > { %v237_v63 = vmul.f32 %v235_v62, %v637_v0 }
  0x66   : > { %238 = vst [vmem:[%s152_s9] sm:$0xff] %v237_v63 }
  0x67   : > { %486 = shalt.err (!%p483_p13)
}
  0x68   : > { %361 = dma.vmem_to_hbm [thread:$0]  (%p604_p9), %s256_s18, 128, %s258_s22, %s240_s23  }
  0x69 PF: > { %s269_s2 = sand.u32 1, %s521_s6   ;;  %p368_p0 = pnand %p345_p12, %p611_p11 }
  0x6a   : > { %s270_s3 = scalar_lea.sflag [#allocation4], %s269_s2 }
  0x6b   : > { %p369_p1 = pneg %p368_p0 }
  0x6d   : > { %516 = dma.done.wait (%p369_p1), %s270_s3, 128  }
  0x6e   : > { %518 = vsyncadd (%p369_p1), %s270_s3, 4294967168  ;;  %s17_s11 = sadd.s32 1, %s541_s11   ;;  %s699_s6 = smov %s525_s7 }
  0x6f   : > { %p14_p2 = scmp.ge.s32.totalorder %s17_s11, 4   ;;  %s700_s7 = smov %s529_s8 }
  0x70   : > { %s701_s8 = smov %s609_s20  ;;  %s702_s9 = smov %s537_s10 }
  0x71   : > { %s703_s10 = smov %s705_s14  ;;  %16 = sbr.rel (!%p14_p2) target bundleno = 6 (0x6), region = 69 }
  0x76   :  { %276 = vsyncpa [#allocation3], 1 }
  0x77   :  { %278 = vsyncpa [#allocation3 + $0x1], 1 }
  0x78   :  { %279 = vsyncpa [#allocation4], 1 }
  0x79   :  { %281 = vsyncpa [#allocation4 + $0x1], 1 }

</bundles_post_ra>
